<compile_context>
chip_gen: v7x
topology: tpu7x:2x2x1
jax: 0.10.0
libtpu: 0.0.40
codegen_flags: <defaults>
</compile_context>

<pallas_src>
import jax
import jax.numpy as jnp
from jax.experimental import pallas as pl
from jax.experimental.pallas import tpu as pltpu


def _sigmoid(x):
    # Exact sigmoid (pl.reciprocal(approx=True) breaks the 1e-5 parity check).
    return 1.0 / (1.0 + jnp.exp(-x))


# --------------------------------------------------------------------------- kernels
def front_kernel(xT_ref, w1_ref, b1_ref, wh_ref, bh_ref, zab_ref):
    """Fused PersonNet + ItemNet for one batch tile (batch on the lane axis).

    xT_ref : (inp_p + inp_i, TILE)     concatenated transposed inputs (bf16 or f32)
    w1_ref : (hp + hi, inp_p + inp_i)  block-diagonal fc1 weight [w1p (+) w1i]
    b1_ref : (hp + hi, 1)              fc1 bias
    wh_ref : (8, hp + hi)              fused heads (row0=z, row1=a pre-abs, row2=b, rows3..7=0)
    bh_ref : (8, 1)                    fused head bias
    zab_ref: (8, TILE)                 output slab, lane-dense full-sublane store
    """
    x = xT_ref[...].astype(jnp.float32)            # exact upcast (binary activations)
    h = jnp.dot(w1_ref[...], x, preferred_element_type=jnp.float32)
    h = _sigmoid(h + b1_ref[...])                  # (hp+hi, TILE)
    zab = jnp.dot(wh_ref[...], h, preferred_element_type=jnp.float32) + bh_ref[...]
    zab_ref[...] = zab                             # (8, TILE)


def _make_bn_irt_kernel(n_valid):
    """Single-shot epilogue: global BatchNorm stats (eps=0, biased var) + IRT link."""
    inv_n = 1.0 / float(n_valid)

    def bn_irt_kernel(zab_ref, p_ref):
        z = zab_ref[0:1, :]                        # (1, b_pad)
        a = jnp.abs(zab_ref[1:2, :])
        b = zab_ref[2:3, :]
        lane = jax.lax.broadcasted_iota(jnp.int32, z.shape, 1)
        mask = lane < n_valid                      # exclude padded lanes from the stats
        zm = jnp.where(mask, z, 0.0)
        mu = jnp.sum(zm, keepdims=True) * inv_n
        dz = jnp.where(mask, z - mu, 0.0)
        var = jnp.sum(dz * dz, keepdims=True) * inv_n
        zn = (z - mu) * jax.lax.rsqrt(var)         # eps = 0
        p_ref[...] = _sigmoid(a * (zn - b))        # (1, b_pad), lane-dense

    return bn_irt_kernel


# --------------------------------------------------------------------------- helpers
def _choose_tile(batch, tile_b):
    tile_b = max(128, (tile_b // 128) * 128)                   # lane-aligned request
    if batch <= 256:
        return batch, batch, 1                                 # single full block, no padding
    b_pad128 = int(pl.cdiv(batch, 128)) * 128
    half = int(pl.cdiv(b_pad128 // 2, 128)) * 128              # >=2 tiles -> both v7x TCs busy
    tile = max(128, min(tile_b, half))
    num_tiles = int(pl.cdiv(batch, tile))
    return int(tile), int(tile * num_tiles), num_tiles


def _vmem_limit(tile, feat, hid, x_itemsize):
    """Honest scoped-VMEM request for the front kernel."""
    need = 2 * feat * tile * x_itemsize                        # x tile, double-buffered
    need += 2 * 8 * tile * 4                                   # zab slab out, double-buffered
    need += 2 * (hid * feat + hid + 8 * hid + 8) * 4           # constant-index weight blocks (2x)
    need += (hid + 8) * tile * 4                               # in-kernel h / zab temporaries
    need += 2 << 20                                            # compiler headroom
    return int(min(max(need, 2 << 20), 48 << 20))              # cap well under v7x 64 MiB VMEM


# --------------------------------------------------------------------------- forward
def cen_forward(x_person, x_item, fused, *, tile_b=4096, x_dtype=jnp.bfloat16):
    """CEN forward: one fused batch-tiled kernel + single-shot BN/IRT epilogue."""
    B = x_person.shape[0]
    inp_p, inp_i = fused["inp_p"], fused["inp_i"]
    assert x_person.shape == (B, inp_p) and x_item.shape == (B, inp_i)
    hid, feat = fused["w1"].shape

    tile, b_pad, num_tiles = _choose_tile(B, tile_b)

    # One producer for concat + transpose + cast (+ pad) so XLA emits a single fused
    # copy.  bf16 is bit-exact for 0/1 response-matrix inputs; use x_dtype=jnp.float32
    # for strict parity on arbitrary float inputs.
    xT = jnp.concatenate([x_person.T, x_item.T], axis=0).astype(x_dtype)
    if b_pad != B:
        xT = jnp.pad(xT, ((0, 0), (0, b_pad - B)))
    x_itemsize = jnp.dtype(x_dtype).itemsize

    zab = pl.pallas_call(
        front_kernel,
        out_shape=jax.ShapeDtypeStruct((8, b_pad), jnp.float32),
        grid=(num_tiles,),
        in_specs=[
            pl.BlockSpec((feat, tile), lambda i: (0, i)),      # x tile (pipelined)
            pl.BlockSpec((hid, feat), lambda i: (0, 0)),       # block-diag fc1 weight (resident)
            pl.BlockSpec((hid, 1), lambda i: (0, 0)),          # fc1 bias
            pl.BlockSpec((8, hid), lambda i: (0, 0)),          # fused head weight
            pl.BlockSpec((8, 1), lambda i: (0, 0)),            # fused head bias
        ],
        out_specs=pl.BlockSpec((8, tile), lambda i: (0, i)),
        compiler_params=pltpu.CompilerParams(
            dimension_semantics=("parallel",),
            vmem_limit_bytes=_vmem_limit(tile, feat, hid, x_itemsize)),
    )(xT, fused["w1"], fused["b1"], fused["whead"], fused["bhead"])

    if b_pad <= 131072:
        # Single-invocation epilogue kernel: masked global BN stats + IRT link.
        p2d = pl.pallas_call(
            _make_bn_irt_kernel(B),
            out_shape=jax.ShapeDtypeStruct((1, b_pad), jnp.float32),
            in_specs=[pl.BlockSpec(memory_space=pltpu.MemorySpace.VMEM)],
            out_specs=pl.BlockSpec(memory_space=pltpu.MemorySpace.VMEM),
            compiler_params=pltpu.CompilerParams(
                vmem_limit_bytes=int(min(9 * b_pad * 4 + (2 << 20), 48 << 20))),
        )(zab)
        return p2d[0, :B]

    # Fallback for very large batches (slab would not fit a single VMEM block): the
    # same math as a tiny XLA epilogue on the (3, B) slice.
    z = zab[0, :B]
    a = jnp.abs(zab[1, :B])
    b = zab[2, :B]
    mu = jnp.mean(z)
    var = jnp.mean(jnp.square(z - mu))
    return _sigmoid(a * ((z - mu) * jax.lax.rsqrt(var) - b))


# --------------------------------------------------------------------------- params
def init_params(key, inp_size_person_net, inp_size_item_net):
    """Deterministic synthetic parameters, PyTorch-Linear-like uniform init (depth=1)."""
    hp = max(inp_size_person_net // 2, 2)       # PersonNet fc1_dim
    hi = max(inp_size_item_net // 2, 2)         # ItemNet  fc1_dim

    def linear(key, fan_in, fan_out):
        kw, kb = jax.random.split(key)
        bound = 1.0 / jnp.sqrt(jnp.float32(fan_in))
        w = jax.random.uniform(kw, (fan_out, fan_in), jnp.float32, -bound, bound)
        b = jax.random.uniform(kb, (fan_out,), jnp.float32, -bound, bound)
        return w, b

    keys = jax.random.split(key, 5)
    w1p, b1p = linear(keys[0], inp_size_person_net, hp)   # PersonNet.fc1
    wlp, blp = linear(keys[1], hp, 1)                     # PersonNet.linear
    w1i, b1i = linear(keys[2], inp_size_item_net, hi)     # ItemNet.fc1
    wa, ba = linear(keys[3], hi, 1)                       # ItemNet.linear_a
    wb, bb = linear(keys[4], hi, 1)                       # ItemNet.linear_b
    return {"w1p": w1p, "b1p": b1p, "wlp": wlp, "blp": blp,
            "w1i": w1i, "b1i": b1i, "wa": wa, "ba": ba, "wb": wb, "bb": bb}


def fuse_params(raw):
    """One-time layout plumbing (outside the hot path): block-diag fc1 + fused 8-row head."""
    hp, inp_p = raw["w1p"].shape
    hi, inp_i = raw["w1i"].shape
    w1 = jnp.zeros((hp + hi, inp_p + inp_i), jnp.float32)
    w1 = w1.at[:hp, :inp_p].set(raw["w1p"]).at[hp:, inp_p:].set(raw["w1i"])
    b1 = jnp.concatenate([raw["b1p"], raw["b1i"]]).reshape(hp + hi, 1)
    wh = jnp.zeros((8, hp + hi), jnp.float32)
    wh = wh.at[0, :hp].set(raw["wlp"][0])        # z head
    wh = wh.at[1, hp:].set(raw["wa"][0])         # a head (abs applied in epilogue)
    wh = wh.at[2, hp:].set(raw["wb"][0])         # b head
    bh = jnp.zeros((8, 1), jnp.float32)
    bh = bh.at[0, 0].set(raw["blp"][0]).at[1, 0].set(raw["ba"][0]).at[2, 0].set(raw["bb"][0])
    return {"w1": w1, "b1": b1, "whead": wh, "bhead": bh,
            "inp_p": int(inp_p), "inp_i": int(inp_i)}


def cen_reference(x_person, x_item, raw):
    """Pure-JAX reference replicating the PyTorch forward (sanity check)."""
    hpv = jax.nn.sigmoid(x_person @ raw["w1p"].T + raw["b1p"])
    z = hpv @ raw["wlp"].T + raw["blp"]                        # (B, 1)
    mu = jnp.mean(z)
    var = jnp.mean((z - mu) ** 2)
    z = (z - mu) / jnp.sqrt(var)                               # BatchNorm1d(1, eps=0), training
    hiv = jax.nn.sigmoid(x_item @ raw["w1i"].T + raw["b1i"])
    a = jnp.abs(hiv @ raw["wa"].T + raw["ba"])
    b = hiv @ raw["wb"].T + raw["bb"]
    return (1.0 / (1.0 + jnp.exp(-a * (z - b))))[:, 0]


# --------------------------------------------------------------------------- main
if __name__ == "__main__":
    INP_PERSON = 16   # num_items  (PersonNet input width)
    INP_ITEM = 16     # num_users  (ItemNet input width)

    key = jax.random.PRNGKey(0)
    k_xp, k_xi, k_params, k_xp2, k_xi2 = jax.random.split(key, 5)
    raw = init_params(k_params, INP_PERSON, INP_ITEM)
    fused = fuse_params(raw)

    # ---- small batch: single tile, no padding ----------------------------------
    B = 8
    x_person = (jax.random.uniform(k_xp, (B, INP_PERSON)) > 0.5).astype(jnp.float32)
    x_item = (jax.random.uniform(k_xi, (B, INP_ITEM)) > 0.5).astype(jnp.float32)

    p = jax.block_until_ready(cen_forward(x_person, x_item, fused))
    p_ref = jax.block_until_ready(cen_reference(x_person, x_item, raw))
    assert p.shape == (B,)
    assert jnp.allclose(p, p_ref, atol=1e-5, rtol=1e-5), float(jnp.max(jnp.abs(p - p_ref)))

    # ---- f32 x path (strict parity mode for non-binary float inputs) -----------
    p_f32 = jax.block_until_ready(cen_forward(x_person, x_item, fused, x_dtype=jnp.float32))
    assert jnp.allclose(p_f32, p_ref, atol=1e-5, rtol=1e-5)

    # ---- larger batch: >=2 batch tiles (megacore split) + padded lane axis -----
    B2 = 300
    xp2 = (jax.random.uniform(k_xp2, (B2, INP_PERSON)) > 0.5).astype(jnp.float32)
    xi2 = (jax.random.uniform(k_xi2, (B2, INP_ITEM)) > 0.5).astype(jnp.float32)
    p2 = jax.block_until_ready(cen_forward(xp2, xi2, fused))
    p2_ref = jax.block_until_ready(cen_reference(xp2, xi2, raw))
    assert p2.shape == (B2,)
    assert jnp.allclose(p2, p2_ref, atol=1e-5, rtol=1e-5), float(jnp.max(jnp.abs(p2 - p2_ref)))

    # ---- same batch with an explicit small tile: exercises a 3-step grid -------
    p3 = jax.block_until_ready(cen_forward(xp2, xi2, fused, tile_b=128))
    assert jnp.allclose(p3, p2_ref, atol=1e-5, rtol=1e-5)

    print("KERNEL_OK")
</pallas_src>

<mosaic_0001>
module attributes {stable_mosaic.version = 11 : i64} {
  func.func @front_kernel(%arg0: i32, %arg1: memref<32x8xbf16, #tpu.memory_space<vmem>>, %arg2: memref<16x32xf32, #tpu.memory_space<vmem>>, %arg3: memref<16x1xf32, #tpu.memory_space<vmem>>, %arg4: memref<8x16xf32, #tpu.memory_space<vmem>>, %arg5: memref<8x1xf32, #tpu.memory_space<vmem>>, %arg6: memref<8x8xf32, #tpu.memory_space<vmem>>) attributes {dimension_semantics = [#tpu.dimension_semantics<parallel>], iteration_bounds = array<i64: 1>, scalar_prefetch = 0 : i64, scratch_operands = 0 : i64, tpu.core_type = #tpu.core_type<tc>, window_params = [{transform_indices = @transform_0, window_bounds = array<i64: 32, 8>}, {pipeline_mode = #tpu.pipeline_mode<synchronous>, transform_indices = @transform_1, window_bounds = array<i64: 16, 32>}, {pipeline_mode = #tpu.pipeline_mode<synchronous>, transform_indices = @transform_2, window_bounds = array<i64: 16, 1>}, {pipeline_mode = #tpu.pipeline_mode<synchronous>, transform_indices = @transform_3, window_bounds = array<i64: 8, 16>}, {pipeline_mode = #tpu.pipeline_mode<synchronous>, transform_indices = @transform_4, window_bounds = array<i64: 8, 1>}, {transform_indices = @transform_5, window_bounds = array<i64: 8, 8>}]} {
    %c0 = arith.constant 0 : index
    %c0_0 = arith.constant 0 : index
    %0 = vector.load %arg1[%c0, %c0_0] : memref<32x8xbf16, #tpu.memory_space<vmem>>, vector<32x8xbf16>
    %1 = arith.extf %0 : vector<32x8xbf16> to vector<32x8xf32>
    %c0_1 = arith.constant 0 : index
    %c0_2 = arith.constant 0 : index
    %2 = vector.load %arg2[%c0_1, %c0_2] : memref<16x32xf32, #tpu.memory_space<vmem>>, vector<16x32xf32>
    %cst = arith.constant dense<0.000000e+00> : vector<16x8xf32>
    %3 = tpu.matmul %2, %1, %cst {dimension_numbers = #tpu.dot_dimension_numbers<[1], [0], [0], [1], [0, 0, 1, 1], [], []>} : vector<16x32xf32>, vector<32x8xf32>, vector<16x8xf32> -> vector<16x8xf32>
    %c0_3 = arith.constant 0 : index
    %c0_4 = arith.constant 0 : index
    %4 = vector.load %arg3[%c0_3, %c0_4] : memref<16x1xf32, #tpu.memory_space<vmem>>, vector<16x1xf32>
    %5 = vector.broadcast %4 : vector<16x1xf32> to vector<16x8xf32>
    %6 = arith.addf %3, %5 : vector<16x8xf32>
    %cst_5 = arith.constant 0.000000e+00 : f32
    %7 = vector.broadcast %cst_5 : f32 to vector<16x8xf32>
    %8 = arith.subf %7, %6 : vector<16x8xf32>
    %9 = math.exp %8 : vector<16x8xf32>
    %cst_6 = arith.constant 1.000000e+00 : f32
    %10 = vector.broadcast %cst_6 : f32 to vector<16x8xf32>
    %11 = arith.addf %10, %9 : vector<16x8xf32>
    %cst_7 = arith.constant 1.000000e+00 : f32
    %12 = vector.broadcast %cst_7 : f32 to vector<16x8xf32>
    %13 = arith.divf %12, %11 : vector<16x8xf32>
    %c0_8 = arith.constant 0 : index
    %c0_9 = arith.constant 0 : index
    %14 = vector.load %arg4[%c0_8, %c0_9] : memref<8x16xf32, #tpu.memory_space<vmem>>, vector<8x16xf32>
    %cst_10 = arith.constant dense<0.000000e+00> : vector<8x8xf32>
    %15 = tpu.matmul %14, %13, %cst_10 {dimension_numbers = #tpu.dot_dimension_numbers<[1], [0], [0], [1], [0, 0, 1, 1], [], []>} : vector<8x16xf32>, vector<16x8xf32>, vector<8x8xf32> -> vector<8x8xf32>
    %c0_11 = arith.constant 0 : index
    %c0_12 = arith.constant 0 : index
    %16 = vector.load %arg5[%c0_11, %c0_12] : memref<8x1xf32, #tpu.memory_space<vmem>>, vector<8x1xf32>
    %17 = vector.broadcast %16 : vector<8x1xf32> to vector<8x8xf32>
    %18 = arith.addf %15, %17 : vector<8x8xf32>
    %c0_13 = arith.constant 0 : index
    %c0_14 = arith.constant 0 : index
    %19 = vector.load %arg6[%c0_13, %c0_14] : memref<8x8xf32, #tpu.memory_space<vmem>>, vector<8x8xf32>
    tpu.vector_store %arg6[%c0_13, %c0_14], %18 {strides = array<i32>} : memref<8x8xf32, #tpu.memory_space<vmem>>, vector<8x8xf32>,
    return
  }
  func.func @transform_0(%arg0: i32) -> (i32, i32) {
    %c0_i32 = arith.constant 0 : i32
    %c0_i32_0 = arith.constant 0 : i32
    return %c0_i32, %arg0 : i32, i32
  }
  func.func @transform_1(%arg0: i32) -> (i32, i32) {
    %c0_i32 = arith.constant 0 : i32
    %c0_i32_0 = arith.constant 0 : i32
    %c0_i32_1 = arith.constant 0 : i32
    return %c0_i32, %c0_i32_0 : i32, i32
  }
  func.func @transform_2(%arg0: i32) -> (i32, i32) {
    %c0_i32 = arith.constant 0 : i32
    %c0_i32_0 = arith.constant 0 : i32
    %c0_i32_1 = arith.constant 0 : i32
    return %c0_i32, %c0_i32_0 : i32, i32
  }
  func.func @transform_3(%arg0: i32) -> (i32, i32) {
    %c0_i32 = arith.constant 0 : i32
    %c0_i32_0 = arith.constant 0 : i32
    %c0_i32_1 = arith.constant 0 : i32
    return %c0_i32, %c0_i32_0 : i32, i32
  }
  func.func @transform_4(%arg0: i32) -> (i32, i32) {
    %c0_i32 = arith.constant 0 : i32
    %c0_i32_0 = arith.constant 0 : i32
    %c0_i32_1 = arith.constant 0 : i32
    return %c0_i32, %c0_i32_0 : i32, i32
  }
  func.func @transform_5(%arg0: i32) -> (i32, i32) {
    %c0_i32 = arith.constant 0 : i32
    %c0_i32_0 = arith.constant 0 : i32
    return %c0_i32, %arg0 : i32, i32
  }
}

</mosaic_0001>

<bundles_post_ra>
// kernel: tpu_custom_call.1
= control target key start
LH: loop header
LB: loop body
LE: loop exit
PB: predicated region body
PF: predicated region fallthrough
CT: control target
= control target key end

     0   :  { %vm43_vm0 = vcmask 261120   ;;  %v323_v4 = vmov 0   ;;  %s394_s0 = inlined_call_operand.vmem [shape: bf16[32,8], index: 0, kind: input, shape index: {}]   ;;  %s395_s1 = inlined_call_operand.vmem [shape: f32[16,32], index: 1, kind: input, shape index: {}]   ;;  %s396_s2 = inlined_call_operand.vmem [shape: f32[16,1], index: 2, kind: input, shape index: {}]   ;;  %s397_s3 = inlined_call_operand.vmem [shape: f32[8,16], index: 3, kind: input, shape index: {}]   ;;  %s398_s4 = inlined_call_operand.vmem [shape: f32[8,1], index: 4, kind: input, shape index: {}]   ;;  %s399_s5 = inlined_call_operand.hbm [shape: f32[8,8], index: 5, kind: output, shape index: {}]  }
   0x1   :  { %v238_v0 = vld [vmem:[%s394_s0] sm:$0xff]   ;;  %v245_v1 = vld [vmem:[%s394_s0 + $0x8] sm:$0xff]   ;;  %289 = vset.pattern.permute.xlu0 %v323_v4 }
   0x2   :  { %v29_v2 = vld [vmem:[%s395_s1] sm:$0xff]  ;;  %274 = vmatprep.subr.bf16.mxu0 %v238_v0 }
   0x3   :  { %263 = vmatprep.mubr.msk.f32.mxu0 %vm43_vm0, %v29_v2  ;;  %v31_v3 = vld [vmem:[%s396_s2] sm:$0xff]  ;;  %276 = vmatpush3.bf16.msra.mxu0 %v238_v0 }
   0x4   :  { %10 = vsyncpa [#allocation3], 0  ;;  %278 = vmatprep.subr.bf16.mxu0 %v245_v1  ;;  %35 = vperm.xlu0 %289, %v31_v3   ;;  %v32_v5 = vld [vmem:[%s396_s2 + $0x8] sm:$0xff]  ;;  %v324_v7 = vmov 0.0|0.0   ;;  %vm325_vm1 = vmmov 0   ;;  %v326_v8 = vmov 0.0  }
   0x5   :  { %290 = vset.pattern.permute.xlu1 %v323_v4  ;;  %v30_v6 = vld [vmem:[%s395_s1 + $0x8] sm:$0xff]  ;;  %281 = vmatprep.subr.bf16.mxu1 %v324_v7  ;;  %v138_v9 = vld [vmem:[%s398_s4] sm:$0xff]  ;;  %vm144_vm2 = vcmask 130048   ;;  %s327_s4 = smov [#allocation2]   ;;  %vm218_vm3 = vcmask 64512  }
   0x6   :  { %270 = vmatprep.mubr.msk.f32.mxu1 %vm325_vm1, %v326_v8  ;;  %141 = vperm.xlu1 %290, %v138_v9   ;;  %v137_v27 = vld [vmem:[%s397_s3] sm:$0xff]  ;;  %s226_s6 = sshll.u32 %s327_s4, 4  ;;  %s227_s6 = int_to_ptr.vmem [resolvable:$true] %s226_s6 }
   0x7   :  { %280 = vmatpush3.bf16.msra.mxu0 %v245_v1  ;;  %s299_s7 = scalar_lea.vmem %s227_s6, 128  ;;  %p304_p1 = scmp.lt.s32.totalorder %s227_s6, %s227_s6 }
   0x8   :  { %40 = vperm.xlu0 %289, %v32_v5   ;;  %p300_p0 = scmp.ne.s32.totalorder %s227_s6, %s299_s7  ;;  %p305_p2 = scmp.lt.s32.totalorder %s299_s7, %s299_s7 }
   0xa   :  { %264 = vmatmul.mubr.msk.f32.vlgmr.msra.gmra.mrb[0].mxu0 %vm43_vm0, %v30_v6  ;;  %p306_p3 = por %p305_p2, %p304_p1 }
   0xc   :  { %p307_p4 = pnand %p306_p3, %p300_p0 }
  0x83   :  { %v36_v10 = vpop.permute.xlu0 %35 }
  0x85   :  { %v142_v28 = vpop.permute.xlu1 %141 }
  0x87   :  { %v41_v11 = vpop.permute.xlu0 %40 }
  0xdd   :  { %v265_v12 = vpop.f32.mrb[0].mxu0 }
  0xde   :  { %v122_v13 = vadd.f32 %v265_v12, %v41_v11  ;;  %v116_v14 = vpop.f32.mrb[1].mxu0 }
  0xdf   :  { %v117_v15 = vadd.f32 %v116_v14, %v36_v10 }
  0xe0   :  { %v126_v16 = vsub.f32 0.0, %v122_v13 }
  0xe1   :  { %v125_v17 = vsub.f32 0.0, %v117_v15 }
  0xe2   :  { %v129_v18 = vmul.f32 1.442695, %v126_v16 }
  0xe3   :  { %v127_v19 = vmul.f32 1.442695, %v125_v17 }
  0xe4   :  { %291 = vpow2.f32 %v129_v18 }
  0xe5   :  { %293 = vpow2.f32 %v127_v19 }
  0xee   :  { %v292_v20 = vpop.eup %291 }
  0xef   :  { %v294_v21 = vpop.eup %293  ;;  %v132_v22 = vadd.f32 1.0, %v292_v20 }
  0xf0   :  { %v131_v23 = vadd.f32 1.0, %v294_v21 }
  0xf1   :  { %295 = vrcp.f32 %v132_v22 }
  0xf2   :  { %297 = vrcp.f32 %v131_v23 }
  0xfb   :  { %v296_v24 = vpop.eup %295 }
  0xfc   :  { %v298_v25 = vpop.eup %297 }
  0xfd   :  { %v282_v26 = vpack.c.bf16 %v296_v24, %v298_v25 }
  0xff   :  { %283 = vmatpush3.bf16.msra.mxu1 %v282_v26 }
 0x102   :  { %271 = vmatmul.mubr.msk.f32.vlgmr.msra.gmra.mrb[0].mxu1 %vm144_vm2, %v137_v27 }
 0x1d5   :  { %v214_v29 = vpop.f32.mrb[0].mxu1 }
 0x1d6   :  { %v215_v30 = vadd.f32 %v214_v29, %v142_v28  ;;  %v272_v31 = vpop.f32.mrb[1].mxu1 }
 0x1d8   :  { %219 = vst.msk [vmem:[#allocation2] sm:$0xff] %vm218_vm3, %v215_v30 }
 0x1d9   :  { %310 = shalt.err (!%p307_p4)
}
 0x1da   :  { %s311_s9 = scalar_lea.hbm %s399_s5, 128 }
 0x1db   :  { %p312_p5 = scmp.ne.s32.totalorder %s399_s5, %s311_s9  ;;  %p315_p6 = scmp.lt.u32.totalorder %s311_s9, %s399_s5 }
 0x1dd   :  { %p317_p7 = pnand %p315_p6, %p312_p5 }
 0x1df   :  { %320 = shalt.err (!%p317_p7)
}
 0x1e0   :  { %229 = dma.vmem_to_hbm [thread:$0]  %s227_s6, 128, %s399_s5, [#allocation3]  }
 0x1e1   :  { %321 = dma.done.wait [#allocation3], 128  }
 0x1e2   :  { %322 = vsyncadd [#allocation3], 4294967168 }
 0x1e3   :  { %233 = vsyncpa [#allocation3], 1 }

</bundles_post_ra>
